<compile_context>
chip_gen: v7x
topology: tpu7x:2x2x1
jax: 0.10.0
libtpu: 0.0.40
codegen_flags: <defaults>
</compile_context>

<pallas_src>
import functools

import jax
import jax.numpy as jnp
from jax.experimental import pallas as pl
from jax.experimental.pallas import tpu as pltpu

LANE = 128


def _round_up(x, m):
    return (x + m - 1) // m * m


def _pad_to(a, shape):
    """Zero-pad array `a` up to `shape` (trailing padding only)."""
    pads = [(0, s - d) for d, s in zip(a.shape, shape)]
    return jnp.pad(a, pads)


def _choose_tile(n_rows, tile_m, row_mult):
    """Row tile: as large as tile_m allows (multiple of row_mult).

    Splits into >=2 grid steps only when the problem is large enough that the
    extra fixed per-step overhead is negligible (gives v7x's two TensorCores
    work without penalizing small problems on single-TC v5e/v6e).
    """
    tile_m = max(row_mult, tile_m - tile_m % row_mult)
    tile = min(tile_m, _round_up(n_rows, row_mult))
    if n_rows > 1024 and pl.cdiv(n_rows, tile) < 2:
        tile = _round_up(pl.cdiv(n_rows, 2), row_mult)
    return tile


def _edge_mlp_kernel(s_ref, t_ref, e_ref, *refs, relu_flags, pack_factor):
    """Fused: [s|t|e] @ W1 + b1 (-> ReLU) -> ... -> @ Wk + bk (-> ReLU).

    The concat is folded into layer 1 via three partial matmuls:
        h1 = s @ W1_s + t @ W1_t + e @ W1_e + b1
    Accumulation is f32 (preferred_element_type); biases are f32; bias add and
    ReLU stay in f32.  If pack_factor > 1 the final (tile, out_dim) result is
    folded to (tile // pack_factor, 128) so the output store is lane-dense.
    """
    out_ref = refs[-1]
    params = refs[:-1]
    f32 = jnp.float32

    w1s, w1t, w1e, b1 = params[0], params[1], params[2], params[3]
    h = (jnp.dot(s_ref[...], w1s[...], preferred_element_type=f32)
         + jnp.dot(t_ref[...], w1t[...], preferred_element_type=f32)
         + jnp.dot(e_ref[...], w1e[...], preferred_element_type=f32)
         + b1[...])                      # bias already f32
    if relu_flags[0]:
        h = jnp.maximum(h, 0.0)

    rest = params[4:]
    for i in range(len(rest) // 2):
        w = rest[2 * i][...]
        b = rest[2 * i + 1][...]
        # Cast activations to the storage/MXU dtype only at the dot input;
        # accumulate in f32, keep bias add + ReLU in f32.
        h = jnp.dot(h.astype(w.dtype), w, preferred_element_type=f32) + b
        if relu_flags[i + 1]:
            h = jnp.maximum(h, 0.0)

    if pack_factor > 1:
        # Fold `pack_factor` logical rows into the lane dim: (tile, out_dim)
        # -> (tile / pack, 128).  Keeps the HBM writeback dense and unpadded.
        tile, od = h.shape
        h = h.reshape(tile // pack_factor, pack_factor * od)

    out_ref[...] = h.astype(out_ref.dtype)


class EdgeModelPallas:
    """JAX/Pallas port of EdgeModel(edge_mlp) with the concat fused into the MLP."""

    def __init__(self, weights, biases, d_source, d_target, d_edge, *,
                 storage_dtype=jnp.float32, tile_m=4096):
        assert weights[0].shape[0] == d_source + d_target + d_edge
        self.d_source, self.d_target, self.d_edge = d_source, d_target, d_edge
        self.out_dim = int(weights[-1].shape[1])
        # ReLU after every layer whose (original) output dim != 1.
        self.relu_flags = tuple(int(w.shape[1]) != 1 for w in weights)
        self.storage_dtype = jnp.dtype(storage_dtype)
        self.tile_m = int(tile_m)

        # Output row-fold factor: pack 128/out_dim rows into one 128-lane row.
        if self.out_dim < LANE and LANE % self.out_dim == 0:
            self.pack_factor = LANE // self.out_dim
        else:
            self.pack_factor = 1
        # tri-state: None = not yet probed, True/False = decided on first call.
        self._pack_ok = None if self.pack_factor > 1 else False

        sd = self.storage_dtype
        n_layers = len(weights)

        w1, b1 = weights[0], biases[0]
        c1 = int(w1.shape[1])
        # Hidden widths padded to 128 lanes; the FINAL layer keeps its natural
        # width (its writeback is handled by the row fold / narrow store).
        c1p = c1 if n_layers == 1 else _round_up(c1, LANE)
        w1s = w1[:d_source]
        w1t = w1[d_source:d_source + d_target]
        w1e = w1[d_source + d_target:]

        params = [
            _pad_to(w1s, (d_source, c1p)).astype(sd),
            _pad_to(w1t, (d_target, c1p)).astype(sd),
            _pad_to(w1e, (d_edge, c1p)).astype(sd),
            _pad_to(b1.reshape(1, -1), (1, c1p)).astype(jnp.float32),  # bias stays f32
        ]
        flops_per_row = 2 * (d_source + d_target + d_edge) * c1p
        prev_p = c1p
        max_w = c1p
        for li, (w, b) in enumerate(zip(weights[1:], biases[1:]), start=1):
            cols = int(w.shape[1])
            colsp = cols if li == n_layers - 1 else _round_up(cols, LANE)
            params.append(_pad_to(w, (prev_p, colsp)).astype(sd))
            params.append(_pad_to(b.reshape(1, -1), (1, colsp)).astype(jnp.float32))
            flops_per_row += 2 * prev_p * colsp
            prev_p = colsp
            max_w = max(max_w, colsp)
        assert prev_p == self.out_dim  # final layer kept at its natural width

        self.params = params
        self._param_bytes = sum(int(p.size) * p.dtype.itemsize for p in params)
        self._flops_per_row = flops_per_row
        self._max_width = max_w

    def __call__(self, source, target, edge_attr):
        if self._pack_ok is None:
            try:
                out = jax.block_until_ready(
                    self._run(source, target, edge_attr, packed=True))
                self._pack_ok = True
                return out
            except Exception:
                # TODO(synk): this Mosaic build can't lower the sublane->lane
                # output fold; fall back to the natural-width output block
                # (same HBM write bytes, masked stores instead of dense vst).
                self._pack_ok = False
        return self._run(source, target, edge_attr, packed=self._pack_ok)

    def _run(self, source, target, edge_attr, *, packed):
        n_rows = int(source.shape[0])
        sd = self.storage_dtype
        pack = self.pack_factor if packed else 1
        sub = max(8, 32 // sd.itemsize)      # sublane packing: 8 (f32), 16 (bf16)
        row_mult = sub * pack
        tile = _choose_tile(n_rows, self.tile_m, row_mult)
        rows_p = _round_up(n_rows, tile)

        def prep(x):
            x = x.astype(sd)
            if rows_p != n_rows:
                x = jnp.pad(x, ((0, rows_p - n_rows), (0, 0)))
            return x

        s, t, e = prep(source), prep(target), prep(edge_attr)

        in_specs = [
            pl.BlockSpec((tile, s.shape[1]), lambda i: (i, 0)),
            pl.BlockSpec((tile, t.shape[1]), lambda i: (i, 0)),
            pl.BlockSpec((tile, e.shape[1]), lambda i: (i, 0)),
        ]
        # Weights/biases: full-array blocks, constant index map -> VMEM-resident.
        for p in self.params:
            in_specs.append(pl.BlockSpec(p.shape, lambda i: (0, 0)))

        if pack > 1:
            out_rows, out_cols = rows_p // pack, pack * self.out_dim  # == 128 lanes
        else:
            out_rows, out_cols = rows_p, self.out_dim
        out_block = (tile // pack, out_cols)

        d_total = self.d_source + self.d_target + self.d_edge
        itemsize = sd.itemsize
        vmem_need = (2 * tile * d_total * itemsize            # double-buffered inputs
                     + 2 * out_block[0] * out_cols * itemsize  # double-buffered output
                     + 2 * tile * self._max_width * 4          # f32 intermediates
                     + self._param_bytes + (4 << 20))          # resident params + slack
        vmem_limit = int(min(max(vmem_need, 32 << 20), 64 << 20))

        cost = pl.CostEstimate(
            flops=int(self._flops_per_row) * rows_p,
            transcendentals=0,
            bytes_accessed=int(rows_p * (d_total + self.out_dim) * itemsize
                               + self._param_bytes),
        )

        kernel = functools.partial(_edge_mlp_kernel,
                                   relu_flags=self.relu_flags, pack_factor=pack)
        out = pl.pallas_call(
            kernel,
            out_shape=jax.ShapeDtypeStruct((out_rows, out_cols), sd),
            grid=(rows_p // tile,),
            in_specs=in_specs,
            out_specs=pl.BlockSpec(out_block, lambda i: (i, 0)),
            compiler_params=pltpu.CompilerParams(
                dimension_semantics=("parallel",),
                vmem_limit_bytes=vmem_limit,
            ),
            cost_estimate=cost,
        )(s, t, e, *self.params)

        if pack > 1:
            out = out.reshape(rows_p, self.out_dim)   # free row-major unfold
        return out[:n_rows]


def init_mlp_params(key, input_dim, fc_dims):
    """PyTorch-Linear-style init: U(-1/sqrt(fan_in), +1/sqrt(fan_in)); W is (in, out)."""
    weights, biases = [], []
    d_in = input_dim
    for d_out in fc_dims:
        key, wk, bk = jax.random.split(key, 3)
        bound = 1.0 / (d_in ** 0.5)
        weights.append(
            jax.random.uniform(wk, (d_in, d_out), jnp.float32, -bound, bound))
        biases.append(
            jax.random.uniform(bk, (d_out,), jnp.float32, -bound, bound))
        d_in = d_out
    return weights, biases


def _edge_model_ref(source, target, edge_attr, weights, biases):
    """Pure-JAX reference matching the PyTorch EdgeModel forward."""
    h = jnp.concatenate([source, target, edge_attr], axis=1)
    for w, b in zip(weights, biases):
        h = h @ w + b
        if w.shape[1] != 1:
            h = jnp.maximum(h, 0.0)
    return h


if __name__ == "__main__":
    key = jax.random.PRNGKey(0)
    k_params, k_data = jax.random.split(key, 2)

    # Small shapes consistent with the module: node features 32-d, edge
    # features 16-d, edge_mlp fc_dims=[64, 16]  -> concat dim 80, output 16.
    d_node, d_edge_in = 32, 16
    fc_dims = [64, 16]
    weights, biases = init_mlp_params(k_params, 2 * d_node + d_edge_in, fc_dims)

    model_f32 = EdgeModelPallas(weights, biases, d_node, d_node, d_edge_in,
                                storage_dtype=jnp.float32)
    model_bf16 = EdgeModelPallas(weights, biases, d_node, d_node, d_edge_in,
                                 storage_dtype=jnp.bfloat16)

    def rand_inputs(k, n):
        ks, kt, ke = jax.random.split(k, 3)
        return (jax.random.normal(ks, (n, d_node), jnp.float32),
                jax.random.normal(kt, (n, d_node), jnp.float32),
                jax.random.normal(ke, (n, d_edge_in), jnp.float32))

    # 48: tiny; 300: non-divisible row count; 2500: multi-step grid (2 blocks).
    for n_edges in (48, 300, 2500):
        src, tgt, eattr = rand_inputs(jax.random.fold_in(k_data, n_edges), n_edges)
        ref = _edge_model_ref(src, tgt, eattr, weights, biases)

        out = jax.block_until_ready(model_f32(src, tgt, eattr))
        assert out.shape == (n_edges, fc_dims[-1])
        assert jnp.allclose(out, ref, atol=5e-4, rtol=5e-4), \
            (n_edges, float(jnp.max(jnp.abs(out - ref))))

        out_b = jax.block_until_ready(model_bf16(src, tgt, eattr))
        assert out_b.shape == (n_edges, fc_dims[-1])
        assert jnp.allclose(out_b.astype(jnp.float32), ref, atol=5e-2, rtol=5e-2), \
            (n_edges, float(jnp.max(jnp.abs(out_b.astype(jnp.float32) - ref))))

    print("KERNEL_OK")
</pallas_src>

<mosaic_0001>
module attributes {stable_mosaic.version = 11 : i64} {
  func.func @_edge_mlp_kernel(%arg0: i32, %arg1: memref<64x32xf32, #tpu.memory_space<vmem>>, %arg2: memref<64x32xf32, #tpu.memory_space<vmem>>, %arg3: memref<64x16xf32, #tpu.memory_space<vmem>>, %arg4: memref<32x128xf32, #tpu.memory_space<vmem>>, %arg5: memref<32x128xf32, #tpu.memory_space<vmem>>, %arg6: memref<16x128xf32, #tpu.memory_space<vmem>>, %arg7: memref<1x128xf32, #tpu.memory_space<vmem>>, %arg8: memref<128x16xf32, #tpu.memory_space<vmem>>, %arg9: memref<1x16xf32, #tpu.memory_space<vmem>>, %arg10: memref<8x128xf32, #tpu.memory_space<vmem>>) attributes {dimension_semantics = [#tpu.dimension_semantics<parallel>], iteration_bounds = array<i64: 1>, scalar_prefetch = 0 : i64, scratch_operands = 0 : i64, tpu.core_type = #tpu.core_type<tc>, window_params = [{transform_indices = @transform_0, window_bounds = array<i64: 64, 32>}, {transform_indices = @transform_1, window_bounds = array<i64: 64, 32>}, {transform_indices = @transform_2, window_bounds = array<i64: 64, 16>}, {pipeline_mode = #tpu.pipeline_mode<synchronous>, transform_indices = @transform_3, window_bounds = array<i64: 32, 128>}, {pipeline_mode = #tpu.pipeline_mode<synchronous>, transform_indices = @transform_4, window_bounds = array<i64: 32, 128>}, {pipeline_mode = #tpu.pipeline_mode<synchronous>, transform_indices = @transform_5, window_bounds = array<i64: 16, 128>}, {pipeline_mode = #tpu.pipeline_mode<synchronous>, transform_indices = @transform_6, window_bounds = array<i64: 1, 128>}, {pipeline_mode = #tpu.pipeline_mode<synchronous>, transform_indices = @transform_7, window_bounds = array<i64: 128, 16>}, {pipeline_mode = #tpu.pipeline_mode<synchronous>, transform_indices = @transform_8, window_bounds = array<i64: 1, 16>}, {transform_indices = @transform_9, window_bounds = array<i64: 8, 128>}]} {
    %c0 = arith.constant 0 : index
    %c0_0 = arith.constant 0 : index
    %0 = vector.load %arg1[%c0, %c0_0] : memref<64x32xf32, #tpu.memory_space<vmem>>, vector<64x32xf32>
    %c0_1 = arith.constant 0 : index
    %c0_2 = arith.constant 0 : index
    %1 = vector.load %arg4[%c0_1, %c0_2] : memref<32x128xf32, #tpu.memory_space<vmem>>, vector<32x128xf32>
    %cst = arith.constant dense<0.000000e+00> : vector<64x128xf32>
    %2 = tpu.matmul %0, %1, %cst {dimension_numbers = #tpu.dot_dimension_numbers<[1], [0], [0], [1], [0, 0, 1, 1], [], []>} : vector<64x32xf32>, vector<32x128xf32>, vector<64x128xf32> -> vector<64x128xf32>
    %c0_3 = arith.constant 0 : index
    %c0_4 = arith.constant 0 : index
    %3 = vector.load %arg2[%c0_3, %c0_4] : memref<64x32xf32, #tpu.memory_space<vmem>>, vector<64x32xf32>
    %c0_5 = arith.constant 0 : index
    %c0_6 = arith.constant 0 : index
    %4 = vector.load %arg5[%c0_5, %c0_6] : memref<32x128xf32, #tpu.memory_space<vmem>>, vector<32x128xf32>
    %cst_7 = arith.constant dense<0.000000e+00> : vector<64x128xf32>
    %5 = tpu.matmul %3, %4, %cst_7 {dimension_numbers = #tpu.dot_dimension_numbers<[1], [0], [0], [1], [0, 0, 1, 1], [], []>} : vector<64x32xf32>, vector<32x128xf32>, vector<64x128xf32> -> vector<64x128xf32>
    %6 = arith.addf %2, %5 : vector<64x128xf32>
    %c0_8 = arith.constant 0 : index
    %c0_9 = arith.constant 0 : index
    %7 = vector.load %arg3[%c0_8, %c0_9] : memref<64x16xf32, #tpu.memory_space<vmem>>, vector<64x16xf32>
    %c0_10 = arith.constant 0 : index
    %c0_11 = arith.constant 0 : index
    %8 = vector.load %arg6[%c0_10, %c0_11] : memref<16x128xf32, #tpu.memory_space<vmem>>, vector<16x128xf32>
    %cst_12 = arith.constant dense<0.000000e+00> : vector<64x128xf32>
    %9 = tpu.matmul %7, %8, %cst_12 {dimension_numbers = #tpu.dot_dimension_numbers<[1], [0], [0], [1], [0, 0, 1, 1], [], []>} : vector<64x16xf32>, vector<16x128xf32>, vector<64x128xf32> -> vector<64x128xf32>
    %10 = arith.addf %6, %9 : vector<64x128xf32>
    %c0_13 = arith.constant 0 : index
    %c0_14 = arith.constant 0 : index
    %11 = vector.load %arg7[%c0_13, %c0_14] : memref<1x128xf32, #tpu.memory_space<vmem>>, vector<1x128xf32>
    %12 = vector.broadcast %11 : vector<1x128xf32> to vector<64x128xf32>
    %13 = arith.addf %10, %12 : vector<64x128xf32>
    %cst_15 = arith.constant 0.000000e+00 : f32
    %14 = vector.broadcast %cst_15 : f32 to vector<64x128xf32>
    %15 = arith.maximumf %13, %14 : vector<64x128xf32>
    %c0_16 = arith.constant 0 : index
    %c0_17 = arith.constant 0 : index
    %16 = vector.load %arg8[%c0_16, %c0_17] : memref<128x16xf32, #tpu.memory_space<vmem>>, vector<128x16xf32>
    %c0_18 = arith.constant 0 : index
    %c0_19 = arith.constant 0 : index
    %17 = vector.load %arg9[%c0_18, %c0_19] : memref<1x16xf32, #tpu.memory_space<vmem>>, vector<1x16xf32>
    %cst_20 = arith.constant dense<0.000000e+00> : vector<64x16xf32>
    %18 = tpu.matmul %15, %16, %cst_20 {dimension_numbers = #tpu.dot_dimension_numbers<[1], [0], [0], [1], [0, 0, 1, 1], [], []>} : vector<64x128xf32>, vector<128x16xf32>, vector<64x16xf32> -> vector<64x16xf32>
    %19 = vector.broadcast %17 : vector<1x16xf32> to vector<64x16xf32>
    %20 = arith.addf %18, %19 : vector<64x16xf32>
    %cst_21 = arith.constant 0.000000e+00 : f32
    %21 = vector.broadcast %cst_21 : f32 to vector<64x16xf32>
    %22 = arith.maximumf %20, %21 : vector<64x16xf32>
    %23 = vector.shape_cast %22 : vector<64x16xf32> to vector<8x128xf32>
    %c0_22 = arith.constant 0 : index
    %c0_23 = arith.constant 0 : index
    %24 = vector.load %arg10[%c0_22, %c0_23] : memref<8x128xf32, #tpu.memory_space<vmem>>, vector<8x128xf32>
    tpu.vector_store %arg10[%c0_22, %c0_23], %23 {strides = array<i32>} : memref<8x128xf32, #tpu.memory_space<vmem>>, vector<8x128xf32>,
    return
  }
  func.func @transform_0(%arg0: i32) -> (i32, i32) {
    %c0_i32 = arith.constant 0 : i32
    %c0_i32_0 = arith.constant 0 : i32
    return %arg0, %c0_i32 : i32, i32
  }
  func.func @transform_1(%arg0: i32) -> (i32, i32) {
    %c0_i32 = arith.constant 0 : i32
    %c0_i32_0 = arith.constant 0 : i32
    return %arg0, %c0_i32 : i32, i32
  }
  func.func @transform_2(%arg0: i32) -> (i32, i32) {
    %c0_i32 = arith.constant 0 : i32
    %c0_i32_0 = arith.constant 0 : i32
    return %arg0, %c0_i32 : i32, i32
  }
  func.func @transform_3(%arg0: i32) -> (i32, i32) {
    %c0_i32 = arith.constant 0 : i32
    %c0_i32_0 = arith.constant 0 : i32
    %c0_i32_1 = arith.constant 0 : i32
    return %c0_i32, %c0_i32_0 : i32, i32
  }
  func.func @transform_4(%arg0: i32) -> (i32, i32) {
    %c0_i32 = arith.constant 0 : i32
    %c0_i32_0 = arith.constant 0 : i32
    %c0_i32_1 = arith.constant 0 : i32
    return %c0_i32, %c0_i32_0 : i32, i32
  }
  func.func @transform_5(%arg0: i32) -> (i32, i32) {
    %c0_i32 = arith.constant 0 : i32
    %c0_i32_0 = arith.constant 0 : i32
    %c0_i32_1 = arith.constant 0 : i32
    return %c0_i32, %c0_i32_0 : i32, i32
  }
  func.func @transform_6(%arg0: i32) -> (i32, i32) {
    %c0_i32 = arith.constant 0 : i32
    %c0_i32_0 = arith.constant 0 : i32
    %c0_i32_1 = arith.constant 0 : i32
    return %c0_i32, %c0_i32_0 : i32, i32
  }
  func.func @transform_7(%arg0: i32) -> (i32, i32) {
    %c0_i32 = arith.constant 0 : i32
    %c0_i32_0 = arith.constant 0 : i32
    %c0_i32_1 = arith.constant 0 : i32
    return %c0_i32, %c0_i32_0 : i32, i32
  }
  func.func @transform_8(%arg0: i32) -> (i32, i32) {
    %c0_i32 = arith.constant 0 : i32
    %c0_i32_0 = arith.constant 0 : i32
    %c0_i32_1 = arith.constant 0 : i32
    return %c0_i32, %c0_i32_0 : i32, i32
  }
  func.func @transform_9(%arg0: i32) -> (i32, i32) {
    %c0_i32 = arith.constant 0 : i32
    %c0_i32_0 = arith.constant 0 : i32
    return %arg0, %c0_i32 : i32, i32
  }
}

module attributes {stable_mosaic.version = 11 : i64} {
  func.func @_edge_mlp_kernel(%arg0: i32, %arg1: memref<48x32xf32, #tpu.memory_space<vmem>>, %arg2: memref<48x32xf32, #tpu.memory_space<vmem>>, %arg3: memref<48x16xf32, #tpu.memory_space<vmem>>, %arg4: memref<32x128xf32, #tpu.memory_space<vmem>>, %arg5: memref<32x128xf32, #tpu.memory_space<vmem>>, %arg6: memref<16x128xf32, #tpu.memory_space<vmem>>, %arg7: memref<1x128xf32, #tpu.memory_space<vmem>>, %arg8: memref<128x16xf32, #tpu.memory_space<vmem>>, %arg9: memref<1x16xf32, #tpu.memory_space<vmem>>, %arg10: memref<48x16xf32, #tpu.memory_space<vmem>>) attributes {dimension_semantics = [#tpu.dimension_semantics<parallel>], iteration_bounds = array<i64: 1>, scalar_prefetch = 0 : i64, scratch_operands = 0 : i64, tpu.core_type = #tpu.core_type<tc>, window_params = [{transform_indices = @transform_0, window_bounds = array<i64: 48, 32>}, {transform_indices = @transform_1, window_bounds = array<i64: 48, 32>}, {transform_indices = @transform_2, window_bounds = array<i64: 48, 16>}, {pipeline_mode = #tpu.pipeline_mode<synchronous>, transform_indices = @transform_3, window_bounds = array<i64: 32, 128>}, {pipeline_mode = #tpu.pipeline_mode<synchronous>, transform_indices = @transform_4, window_bounds = array<i64: 32, 128>}, {pipeline_mode = #tpu.pipeline_mode<synchronous>, transform_indices = @transform_5, window_bounds = array<i64: 16, 128>}, {pipeline_mode = #tpu.pipeline_mode<synchronous>, transform_indices = @transform_6, window_bounds = array<i64: 1, 128>}, {pipeline_mode = #tpu.pipeline_mode<synchronous>, transform_indices = @transform_7, window_bounds = array<i64: 128, 16>}, {pipeline_mode = #tpu.pipeline_mode<synchronous>, transform_indices = @transform_8, window_bounds = array<i64: 1, 16>}, {transform_indices = @transform_9, window_bounds = array<i64: 48, 16>}]} {
    %c0 = arith.constant 0 : index
    %c0_0 = arith.constant 0 : index
    %0 = vector.load %arg1[%c0, %c0_0] : memref<48x32xf32, #tpu.memory_space<vmem>>, vector<48x32xf32>
    %c0_1 = arith.constant 0 : index
    %c0_2 = arith.constant 0 : index
    %1 = vector.load %arg4[%c0_1, %c0_2] : memref<32x128xf32, #tpu.memory_space<vmem>>, vector<32x128xf32>
    %cst = arith.constant dense<0.000000e+00> : vector<48x128xf32>
    %2 = tpu.matmul %0, %1, %cst {dimension_numbers = #tpu.dot_dimension_numbers<[1], [0], [0], [1], [0, 0, 1, 1], [], []>} : vector<48x32xf32>, vector<32x128xf32>, vector<48x128xf32> -> vector<48x128xf32>
    %c0_3 = arith.constant 0 : index
    %c0_4 = arith.constant 0 : index
    %3 = vector.load %arg2[%c0_3, %c0_4] : memref<48x32xf32, #tpu.memory_space<vmem>>, vector<48x32xf32>
    %c0_5 = arith.constant 0 : index
    %c0_6 = arith.constant 0 : index
    %4 = vector.load %arg5[%c0_5, %c0_6] : memref<32x128xf32, #tpu.memory_space<vmem>>, vector<32x128xf32>
    %cst_7 = arith.constant dense<0.000000e+00> : vector<48x128xf32>
    %5 = tpu.matmul %3, %4, %cst_7 {dimension_numbers = #tpu.dot_dimension_numbers<[1], [0], [0], [1], [0, 0, 1, 1], [], []>} : vector<48x32xf32>, vector<32x128xf32>, vector<48x128xf32> -> vector<48x128xf32>
    %6 = arith.addf %2, %5 : vector<48x128xf32>
    %c0_8 = arith.constant 0 : index
    %c0_9 = arith.constant 0 : index
    %7 = vector.load %arg3[%c0_8, %c0_9] : memref<48x16xf32, #tpu.memory_space<vmem>>, vector<48x16xf32>
    %c0_10 = arith.constant 0 : index
    %c0_11 = arith.constant 0 : index
    %8 = vector.load %arg6[%c0_10, %c0_11] : memref<16x128xf32, #tpu.memory_space<vmem>>, vector<16x128xf32>
    %cst_12 = arith.constant dense<0.000000e+00> : vector<48x128xf32>
    %9 = tpu.matmul %7, %8, %cst_12 {dimension_numbers = #tpu.dot_dimension_numbers<[1], [0], [0], [1], [0, 0, 1, 1], [], []>} : vector<48x16xf32>, vector<16x128xf32>, vector<48x128xf32> -> vector<48x128xf32>
    %10 = arith.addf %6, %9 : vector<48x128xf32>
    %c0_13 = arith.constant 0 : index
    %c0_14 = arith.constant 0 : index
    %11 = vector.load %arg7[%c0_13, %c0_14] : memref<1x128xf32, #tpu.memory_space<vmem>>, vector<1x128xf32>
    %12 = vector.broadcast %11 : vector<1x128xf32> to vector<48x128xf32>
    %13 = arith.addf %10, %12 : vector<48x128xf32>
    %cst_15 = arith.constant 0.000000e+00 : f32
    %14 = vector.broadcast %cst_15 : f32 to vector<48x128xf32>
    %15 = arith.maximumf %13, %14 : vector<48x128xf32>
    %c0_16 = arith.constant 0 : index
    %c0_17 = arith.constant 0 : index
    %16 = vector.load %arg8[%c0_16, %c0_17] : memref<128x16xf32, #tpu.memory_space<vmem>>, vector<128x16xf32>
    %c0_18 = arith.constant 0 : index
    %c0_19 = arith.constant 0 : index
    %17 = vector.load %arg9[%c0_18, %c0_19] : memref<1x16xf32, #tpu.memory_space<vmem>>, vector<1x16xf32>
    %cst_20 = arith.constant dense<0.000000e+00> : vector<48x16xf32>
    %18 = tpu.matmul %15, %16, %cst_20 {dimension_numbers = #tpu.dot_dimension_numbers<[1], [0], [0], [1], [0, 0, 1, 1], [], []>} : vector<48x128xf32>, vector<128x16xf32>, vector<48x16xf32> -> vector<48x16xf32>
    %19 = vector.broadcast %17 : vector<1x16xf32> to vector<48x16xf32>
    %20 = arith.addf %18, %19 : vector<48x16xf32>
    %cst_21 = arith.constant 0.000000e+00 : f32
    %21 = vector.broadcast %cst_21 : f32 to vector<48x16xf32>
    %22 = arith.maximumf %20, %21 : vector<48x16xf32>
    %c0_22 = arith.constant 0 : index
    %c0_23 = arith.constant 0 : index
    %23 = vector.load %arg10[%c0_22, %c0_23] : memref<48x16xf32, #tpu.memory_space<vmem>>, vector<48x16xf32>
    tpu.vector_store %arg10[%c0_22, %c0_23], %22 {strides = array<i32>} : memref<48x16xf32, #tpu.memory_space<vmem>>, vector<48x16xf32>,
    return
  }
  func.func @transform_0(%arg0: i32) -> (i32, i32) {
    %c0_i32 = arith.constant 0 : i32
    %c0_i32_0 = arith.constant 0 : i32
    return %arg0, %c0_i32 : i32, i32
  }
  func.func @transform_1(%arg0: i32) -> (i32, i32) {
    %c0_i32 = arith.constant 0 : i32
    %c0_i32_0 = arith.constant 0 : i32
    return %arg0, %c0_i32 : i32, i32
  }
  func.func @transform_2(%arg0: i32) -> (i32, i32) {
    %c0_i32 = arith.constant 0 : i32
    %c0_i32_0 = arith.constant 0 : i32
    return %arg0, %c0_i32 : i32, i32
  }
  func.func @transform_3(%arg0: i32) -> (i32, i32) {
    %c0_i32 = arith.constant 0 : i32
    %c0_i32_0 = arith.constant 0 : i32
    %c0_i32_1 = arith.constant 0 : i32
    return %c0_i32, %c0_i32_0 : i32, i32
  }
  func.func @transform_4(%arg0: i32) -> (i32, i32) {
    %c0_i32 = arith.constant 0 : i32
    %c0_i32_0 = arith.constant 0 : i32
    %c0_i32_1 = arith.constant 0 : i32
    return %c0_i32, %c0_i32_0 : i32, i32
  }
  func.func @transform_5(%arg0: i32) -> (i32, i32) {
    %c0_i32 = arith.constant 0 : i32
    %c0_i32_0 = arith.constant 0 : i32
    %c0_i32_1 = arith.constant 0 : i32
    return %c0_i32, %c0_i32_0 : i32, i32
  }
  func.func @transform_6(%arg0: i32) -> (i32, i32) {
    %c0_i32 = arith.constant 0 : i32
    %c0_i32_0 = arith.constant 0 : i32
    %c0_i32_1 = arith.constant 0 : i32
    return %c0_i32, %c0_i32_0 : i32, i32
  }
  func.func @transform_7(%arg0: i32) -> (i32, i32) {
    %c0_i32 = arith.constant 0 : i32
    %c0_i32_0 = arith.constant 0 : i32
    %c0_i32_1 = arith.constant 0 : i32
    return %c0_i32, %c0_i32_0 : i32, i32
  }
  func.func @transform_8(%arg0: i32) -> (i32, i32) {
    %c0_i32 = arith.constant 0 : i32
    %c0_i32_0 = arith.constant 0 : i32
    %c0_i32_1 = arith.constant 0 : i32
    return %c0_i32, %c0_i32_0 : i32, i32
  }
  func.func @transform_9(%arg0: i32) -> (i32, i32) {
    %c0_i32 = arith.constant 0 : i32
    %c0_i32_0 = arith.constant 0 : i32
    return %arg0, %c0_i32 : i32, i32
  }
}

</mosaic_0001>

<bundles_post_ra>
// kernel: tpu_custom_call.1
= control target key start
LH: loop header
LB: loop body
LE: loop exit
PB: predicated region body
PF: predicated region fallthrough
CT: control target
= control target key end

     0   :  { %vm52_vm0 = vcmask 261120   ;;  %vm287_vm1 = vcmask 130048   ;;  %s1012_s4 = inlined_call_operand.vmem [shape: f32[32,128], index: 4, kind: input, shape index: {}]   ;;  %s1013_s1 = inlined_call_operand.vmem [shape: f32[48,32], index: 1, kind: input, shape index: {}]   ;;  %s1014_s3 = inlined_call_operand.vmem [shape: f32[32,128], index: 3, kind: input, shape index: {}]   ;;  %s1015_s5 = inlined_call_operand.vmem [shape: f32[16,128], index: 5, kind: input, shape index: {}]   ;;  %s1016_s7 = inlined_call_operand.vmem [shape: f32[128,16], index: 7, kind: input, shape index: {}]   ;;  %s1017_s0 = inlined_call_operand.vmem [shape: f32[48,32], index: 0, kind: input, shape index: {}]   ;;  %s1018_s2 = inlined_call_operand.vmem [shape: f32[48,16], index: 2, kind: input, shape index: {}]   ;;  %s1019_s6 = inlined_call_operand.vmem [shape: f32[1,128], index: 6, kind: input, shape index: {}]   ;;  %s1020_s8 = inlined_call_operand.vmem [shape: f32[1,16], index: 8, kind: input, shape index: {}]   ;;  %s1021_s9 = inlined_call_operand.vmem [shape: f32[48,16], index: 9, kind: output, shape index: {}]  }
   0x1   :  { %v48_v0 = vld [vmem:[%s1012_s4] sm:$0xff]  ;;  %v49_v1 = vld [vmem:[%s1012_s4 + $0x8] sm:$0xff]  ;;  %v50_v2 = vld [vmem:[%s1012_s4 + $0x10] sm:$0xff] }
   0x2   :  { %v718_v3 = vpack.c.bf16 %v49_v1, %v48_v0  ;;  %v51_v4 = vld [vmem:[%s1012_s4 + $0x18] sm:$0xff]  ;;  %v42_v5 = vld [vmem:[%s1013_s1] sm:$0xff]  ;;  %v39_v8 = vld [vmem:[%s1014_s3 + $0x8] sm:$0xff] }
   0x3   :  { %v722_v6 = vpack.c.bf16 %v51_v4, %v50_v2  ;;  %638 = vmatprep.mubr.msk.f32.mxu0 %vm52_vm0, %v42_v5  ;;  %v38_v7 = vld [vmem:[%s1014_s3] sm:$0xff]  ;;  %v40_v10 = vld [vmem:[%s1014_s3 + $0x10] sm:$0xff]  ;;  %v41_v11 = vld [vmem:[%s1014_s3 + $0x18] sm:$0xff] }
   0x4   :  { %719 = vmatprep.subr.bf16.mxu0 %v718_v3  ;;  %v726_v9 = vpack.c.bf16 %v39_v8, %v38_v7  ;;  %v43_v12 = vld [vmem:[%s1013_s1 + $0x8] sm:$0xff]  ;;  %v44_v13 = vld [vmem:[%s1013_s1 + $0x10] sm:$0xff]  ;;  %v730_v14 = vpack.c.bf16 %v41_v11, %v40_v10  ;;  %v285_v15 = vld [vmem:[%s1015_s5] sm:$0xff] }
   0x5   :  { %721 = vmatpush3.bf16.msra.mxu0 %v718_v3  ;;  %v426_v16 = vld [vmem:[%s1016_s7] sm:$0xff]  ;;  %v427_v17 = vld [vmem:[%s1016_s7 + $0x8] sm:$0xff]  ;;  %v428_v20 = vld [vmem:[%s1016_s7 + $0x10] sm:$0xff] }
   0x6   :  { %723 = vmatprep.subr.bf16.mxu0 %v722_v6  ;;  %v286_v18 = vld [vmem:[%s1015_s5 + $0x8] sm:$0xff]  ;;  %v738_v19 = vpack.c.bf16 %v427_v17, %v426_v16  ;;  %v429_v21 = vld [vmem:[%s1016_s7 + $0x18] sm:$0xff]  ;;  %v430_v24 = vld [vmem:[%s1016_s7 + $0x20] sm:$0xff] }
   0x7   :  { %v742_v22 = vpack.c.bf16 %v429_v21, %v428_v20  ;;  %v45_v23 = vld [vmem:[%s1013_s1 + $0x18] sm:$0xff]  ;;  %v431_v25 = vld [vmem:[%s1016_s7 + $0x28] sm:$0xff]  ;;  %v46_v26 = vld [vmem:[%s1013_s1 + $0x20] sm:$0xff]  ;;  %v734_v27 = vpack.c.bf16 %v286_v18, %v285_v15 }
   0x8   :  { %739 = vmatprep.subr.bf16.mxu1 %v738_v19  ;;  %v746_v28 = vpack.c.bf16 %v431_v25, %v430_v24  ;;  %v47_v29 = vld [vmem:[%s1013_s1 + $0x28] sm:$0xff]  ;;  %v432_v30 = vld [vmem:[%s1016_s7 + $0x30] sm:$0xff]  ;;  %v433_v31 = vld [vmem:[%s1016_s7 + $0x38] sm:$0xff] }
   0x9   :  { %725 = vmatpush3.bf16.msra.mxu0 %v722_v6  ;;  %741 = vmatpush3.bf16.msra.mxu1 %v738_v19  ;;  %v32_v32 = vld [vmem:[%s1017_s0] sm:$0xff]  ;;  %v750_v33 = vpack.c.bf16 %v433_v31, %v432_v30  ;;  %v33_v34 = vld [vmem:[%s1017_s0 + $0x8] sm:$0xff]  ;;  %v34_v37 = vld [vmem:[%s1017_s0 + $0x10] sm:$0xff] }
   0xa   :  { %727 = vmatprep.subr.bf16.mxu0 %v726_v9  ;;  %743 = vmatprep.subr.bf16.mxu1 %v742_v22  ;;  %v434_v35 = vld [vmem:[%s1016_s7 + $0x40] sm:$0xff]  ;;  %v435_v36 = vld [vmem:[%s1016_s7 + $0x48] sm:$0xff]  ;;  %v35_v39 = vld [vmem:[%s1017_s0 + $0x18] sm:$0xff] }
   0xb   :  { %v754_v38 = vpack.c.bf16 %v435_v36, %v434_v35  ;;  %v436_v40 = vld [vmem:[%s1016_s7 + $0x50] sm:$0xff]  ;;  %v437_v41 = vld [vmem:[%s1016_s7 + $0x58] sm:$0xff]  ;;  %v36_v42 = vld [vmem:[%s1017_s0 + $0x20] sm:$0xff] }
   0xc   :  { %639 = vmatmul.mubr.msk.f32.vlgmr.msra.gmra.mrb[0].mxu0 %vm52_vm0, %v43_v12  ;;  %v758_v43 = vpack.c.bf16 %v437_v41, %v436_v40  ;;  %v37_v44 = vld [vmem:[%s1017_s0 + $0x28] sm:$0xff]  ;;  %v438_v45 = vld [vmem:[%s1016_s7 + $0x60] sm:$0xff]  ;;  %v281_v50 = vld [vmem:[%s1018_s2 + $0x10] sm:$0xff] }
   0xd   :  { %729 = vmatpush3.bf16.msra.mxu0 %v726_v9  ;;  %641 = vmatprep.mubr.msk.f32.mxu0 %vm52_vm0, %v44_v13  ;;  %v439_v46 = vld [vmem:[%s1016_s7 + $0x68] sm:$0xff]  ;;  %v279_v47 = vld [vmem:[%s1018_s2] sm:$0xff]  ;;  %v282_v51 = vld [vmem:[%s1018_s2 + $0x18] sm:$0xff] }
   0xe   :  { %731 = vmatprep.subr.bf16.mxu0 %v730_v14  ;;  %745 = vmatpush3.bf16.msra.mxu1 %v742_v22  ;;  %v762_v48 = vpack.c.bf16 %v439_v46, %v438_v45  ;;  %v280_v49 = vld [vmem:[%s1018_s2 + $0x8] sm:$0xff]  ;;  %v283_v52 = vld [vmem:[%s1018_s2 + $0x20] sm:$0xff]  ;;  %v440_v54 = vld [vmem:[%s1016_s7 + $0x70] sm:$0xff] }
   0xf   :  { %747 = vmatprep.subr.bf16.mxu1 %v746_v28  ;;  %v284_v53 = vld [vmem:[%s1018_s2 + $0x28] sm:$0xff]  ;;  %v441_v55 = vld [vmem:[%s1016_s7 + $0x78] sm:$0xff]  ;;  %v578_v57 = vld [vmem:[%s1019_s6] ss:$0 sm:$0xff] }
  0x10   :  { %642 = vmatmul.mubr.msk.f32.gmra.mrb[2].mxu0 %vm52_vm0, %v45_v23  ;;  %v766_v56 = vpack.c.bf16 %v441_v55, %v440_v54  ;;  %v579_v12 = vld [vmem:[%s1020_s8] ss:$0 sm:$0xff] }
  0x11   :  { %644 = vmatprep.mubr.msk.f32.mxu0 %vm52_vm0, %v46_v26  ;;  %733 = vmatpush3.bf16.msra.mxu0 %v730_v14 }
  0x12   :  { %735 = vmatprep.subr.bf16.mxu0 %v734_v27  ;;  %749 = vmatpush3.bf16.msra.mxu1 %v746_v28 }
  0x13   :  { %751 = vmatprep.subr.bf16.mxu1 %v750_v33 }
  0x14   :  { %645 = vmatmul.mubr.msk.f32.gmra.mrb[4].mxu0 %vm52_vm0, %v47_v29 }
  0x15   :  { %655 = vmatprep.mubr.msk.f32.mxu0 %vm52_vm0, %v32_v32 }
  0x16   :  { %753 = vmatpush3.bf16.msra.mxu1 %v750_v33 }
  0x17   :  { %755 = vmatprep.subr.bf16.mxu1 %v754_v38 }
  0x18   :  { %656 = vmatmul.mubr.msk.f32.vlgmr.msra.gmra.mrb[0].mxu0 %vm52_vm0, %v33_v34 }
  0x19   :  { %737 = vmatpush3.bf16.msra.mxu0 %v734_v27  ;;  %658 = vmatprep.mubr.msk.f32.mxu0 %vm52_vm0, %v34_v37 }
  0x1a   :  { %757 = vmatpush3.bf16.msra.mxu1 %v754_v38 }
  0x1b   :  { %759 = vmatprep.subr.bf16.mxu1 %v758_v43 }
  0x1c   :  { %659 = vmatmul.mubr.msk.f32.gmra.mrb[2].mxu0 %vm52_vm0, %v35_v39 }
  0x1d   :  { %661 = vmatprep.mubr.msk.f32.mxu0 %vm52_vm0, %v36_v42 }
  0x1e   :  { %761 = vmatpush3.bf16.msra.mxu1 %v758_v43 }
  0x1f   :  { %763 = vmatprep.subr.bf16.mxu1 %v762_v48 }
  0x20   :  { %662 = vmatmul.mubr.msk.f32.gmra.mrb[4].mxu0 %vm52_vm0, %v37_v44 }
  0x21   :  { %668 = vmatprep.mubr.msk.f32.mxu0 %vm287_vm1, %v279_v47 }
  0x22   :  { %765 = vmatpush3.bf16.msra.mxu1 %v762_v48 }
  0x23   :  { %767 = vmatprep.subr.bf16.mxu1 %v766_v56 }
  0x24   :  { %669 = vmatmul.mubr.msk.f32.vlgmr.msra.gmra.mrb[0].mxu0 %vm287_vm1, %v280_v49 }
  0x25   :  { %671 = vmatprep.mubr.msk.f32.mxu0 %vm287_vm1, %v281_v50 }
  0x26   :  { %769 = vmatpush3.bf16.msra.mxu1 %v766_v56 }
  0x28   :  { %672 = vmatmul.mubr.msk.f32.gmra.mrb[2].mxu0 %vm287_vm1, %v282_v51 }
  0x29   :  { %674 = vmatprep.mubr.msk.f32.mxu0 %vm287_vm1, %v283_v52 }
  0x2c   :  { %675 = vmatmul.mubr.msk.f32.gmra.mrb[4].mxu0 %vm287_vm1, %v284_v53 }
  0xf7   :  { %v670_v58 = vpop.f32.mrb[0].mxu0 }
  0xf8   :  { %v415_v59 = vadd.f32 %v670_v58, %v578_v57  ;;  %v372_v60 = vpop.f32.mrb[1].mxu0 }
  0xf9   :  { %v414_v61 = vadd.f32 %v578_v57, %v372_v60 }
  0xfa   :  { %v421_v0 = vmax.f32 %v415_v59, 0.0 }
  0xfb   :  { %v673_v62 = vpop.f32.mrb[2].mxu0  ;;  %v420_v63 = vmax.f32 %v414_v61, 0.0 }
  0xfc   :  { %v417_v1 = vadd.f32 %v673_v62, %v578_v57  ;;  %v382_v2 = vpop.f32.mrb[3].mxu0 }
  0xfd   :  { %v416_v3 = vadd.f32 %v578_v57, %v382_v2  ;;  %709 = vmatprep.mubr.f32.mxu1 %v420_v63 }
  0xfe   :  { %710 = vmatmul.mubr.f32.vlgmr.msra.gmra.mrb[0].mxu1 %v421_v0  ;;  %v423_v6 = vmax.f32 %v417_v1, 0.0 }
  0xff   :  { %v422_v4 = vmax.f32 %v416_v3, 0.0  ;;  %v676_v5 = vpop.f32.mrb[4].mxu0 }
 0x100   :  { %v419_v7 = vadd.f32 %v676_v5, %v578_v57  ;;  %v392_v8 = vpop.f32.mrb[5].mxu0 }
 0x101   :  { %v418_v9 = vadd.f32 %v578_v57, %v392_v8  ;;  %712 = vmatprep.mubr.f32.mxu1 %v422_v4 }
 0x102   :  { %713 = vmatmul.mubr.f32.gmra.mrb[2].mxu1 %v423_v6  ;;  %v425_v11 = vmax.f32 %v419_v7, 0.0 }
 0x103   :  { %v424_v10 = vmax.f32 %v418_v9, 0.0 }
 0x105   :  { %715 = vmatprep.mubr.f32.mxu1 %v424_v10 }
 0x106   :  { %716 = vmatmul.mubr.f32.gmra.mrb[4].mxu1 %v425_v11 }
 0x1d1   :  { %v711_v13 = vpop.f32.mrb[0].mxu1 }
 0x1d2   :  { %v521_v14 = vadd.f32 %v711_v13, %v579_v12  ;;  %v515_v15 = vpop.f32.mrb[1].mxu1 }
 0x1d3   :  { %v516_v16 = vadd.f32 %v579_v12, %v515_v15 }
 0x1d4   :  { %v545_v17 = vmax.f32 %v521_v14, 0.0 }
 0x1d5   :  { %v544_v18 = vmax.f32 %v516_v16, 0.0  ;;  %v714_v19 = vpop.f32.mrb[2].mxu1 }
 0x1d6   :  { %551 = vst.msk [vmem:[%s1021_s9 + $0x8] sm:$0xff] %vm287_vm1, %v545_v17  ;;  %v531_v20 = vadd.f32 %v714_v19, %v579_v12  ;;  %v525_v21 = vpop.f32.mrb[3].mxu1 }
 0x1d7   :  { %550 = vst.msk [vmem:[%s1021_s9] sm:$0xff] %vm287_vm1, %v544_v18  ;;  %v526_v22 = vadd.f32 %v579_v12, %v525_v21 }
 0x1d8   :  { %v547_v23 = vmax.f32 %v531_v20, 0.0 }
 0x1d9   :  { %v546_v24 = vmax.f32 %v526_v22, 0.0  ;;  %v717_v25 = vpop.f32.mrb[4].mxu1 }
 0x1da   :  { %553 = vst.msk [vmem:[%s1021_s9 + $0x18] sm:$0xff] %vm287_vm1, %v547_v23  ;;  %v541_v26 = vadd.f32 %v717_v25, %v579_v12  ;;  %v535_v27 = vpop.f32.mrb[5].mxu1 }
 0x1db   :  { %552 = vst.msk [vmem:[%s1021_s9 + $0x10] sm:$0xff] %vm287_vm1, %v546_v24  ;;  %v536_v28 = vadd.f32 %v579_v12, %v535_v27 }
 0x1dc   :  { %v549_v29 = vmax.f32 %v541_v26, 0.0 }
 0x1dd   :  { %v548_v30 = vmax.f32 %v536_v28, 0.0 }
 0x1de   :  { %555 = vst.msk [vmem:[%s1021_s9 + $0x28] sm:$0xff] %vm287_vm1, %v549_v29 }
 0x1df   :  { %554 = vst.msk [vmem:[%s1021_s9 + $0x20] sm:$0xff] %vm287_vm1, %v548_v30 }

</bundles_post_ra>
